<compile_context>
chip_gen: v7x
topology: tpu7x:2x2x1
jax: 0.10.0
libtpu: 0.0.40
codegen_flags: <defaults>
</compile_context>

<pallas_src>
import math

import jax
import jax.numpy as jnp
import numpy as np
from jax.experimental import pallas as pl
from jax.experimental.pallas import tpu as pltpu

LOG_2PI = math.log(2.0 * math.pi)

# static problem sizes (small, TPU-friendly full-array blocks)
N_ROWS = 8          # n            (batch)
N_COND = 4          # n_conditions (perturbation plate size)
X_DIM = 32          # observed feature dim
LATENT = 16         # latent dim (both z and E)
N_PART = 2          # n_particles


def elbo_loss_kernel(
    xd_ref,       # (n, x_dim + C)   [X | D]
    z_ref,        # (P+2, n, L)      [z_1..z_P ; q_z mean ; q_z log-scale]
    e_ref,        # (P+2, C, L)      [E_1..E_P ; q_E mean ; q_E log-scale]
    w_ref,        # (L, x_dim)       decoder weights
    const_ref,    # (3, x_dim)       [decoder bias ; p_x log-scale ; D_obs_counts (zero padded)]
    out_ref,      # (8, 128)         rows 0..3 = [loss, -mean_recon, -mean_z, -mean_E]
):
    Pp2, n, L = z_ref.shape
    P = Pp2 - 2
    C = e_ref.shape[1]
    x_dim = w_ref.shape[1]
    inv_pn = 1.0 / float(P * n)

    X = xd_ref[:, :x_dim]                  # (n, x_dim)
    D = xd_ref[:, x_dim:]                  # (n, C)
    W = w_ref[...]                         # (L, x_dim)
    b = const_ref[0:1, :]                  # (1, x_dim)
    x_ls = const_ref[1:2, :]               # (1, x_dim)
    counts = const_ref[2:3, :C]            # (1, C)

    qz_mu = z_ref[P]                       # (n, L)
    qz_ls = z_ref[P + 1]                   # (n, L)
    qe_mu = e_ref[P]                       # (C, L)
    qe_ls = e_ref[P + 1]                   # (C, L)

    inv_qz = jnp.exp(-qz_ls)
    inv_qe = jnp.exp(-qe_ls)
    inv_sx = jnp.exp(-x_ls)
    cst = -x_ls - 0.5 * LOG_2PI            # per-feature recon constant

    # Per-particle pass: build latent rows for the decoder (MXU D@E) and
    # pre-accumulate the z / E KL-style terms with VPU adds (one tile each,
    # one cross-lane reduce per term at the end).  0.5*log(2*pi) cancels in
    # log p - log q, so it is omitted.
    lat_rows = []
    z_acc = None
    lt_acc = None
    for p in range(P):
        zp = z_ref[p]                      # (n, L)
        ep = e_ref[p]                      # (C, L)
        lat_rows.append(zp + jnp.dot(D, ep, preferred_element_type=jnp.float32))

        rz = (zp - qz_mu) * inv_qz
        tz = -0.5 * zp * zp + 0.5 * rz * rz + qz_ls
        z_acc = tz if z_acc is None else z_acc + tz

        re = (ep - qe_mu) * inv_qe
        te = -0.5 * ep * ep + 0.5 * re * re + qe_ls
        lt_acc = te if lt_acc is None else lt_acc + te

    latent2 = jnp.concatenate(lat_rows, axis=0)            # (P*n, L) sublane concat

    # ---- decoder: single 2-D MXU matmul, x_mu never leaves VMEM ------------
    x_mu2 = jnp.dot(latent2, W, preferred_element_type=jnp.float32) + b   # (P*n, x_dim)

    # ---- reconstruction: p_x.log_prob(X).sum(-1), mean over (P, n) ----------
    recon_acc = None
    for p in range(P):
        r = (X - x_mu2[p * n:(p + 1) * n]) * inv_sx
        t = cst - 0.5 * r * r
        recon_acc = t if recon_acc is None else recon_acc + t
    recon_sum = jnp.sum(recon_acc)

    # ---- local z term -------------------------------------------------------
    z_sum = jnp.sum(z_acc)

    # ---- perturbation-plated E term, reweighted in-kernel -------------------
    # inf -> 0 semantics of the torch code: conditions with zero observations get
    # weight 0, intentionally dropping their E-term mass even where D[i,c] != 0.
    scaling = jnp.where(counts > 0, 1.0 / jnp.where(counts > 0, counts, 1.0), 0.0)
    rw = (D != 0).astype(jnp.float32) * scaling             # (n, C)
    # sum_p (rw @ lt_p) == rw @ (sum_p lt_p)  (exact, linear) -> one tiny MXU dot
    e_sum = jnp.sum(jnp.dot(rw, lt_acc, preferred_element_type=jnp.float32))

    neg_recon = -recon_sum * inv_pn
    neg_z = -z_sum * inv_pn
    neg_e = -e_sum * inv_pn
    loss = neg_recon + neg_z + neg_e

    # Lane-dense single output block (full unmasked 128-wide vst).
    row = jax.lax.broadcasted_iota(jnp.int32, out_ref.shape, 0)
    out_ref[...] = jnp.where(
        row == 0, loss,
        jnp.where(row == 1, neg_recon,
                  jnp.where(row == 2, neg_z,
                            jnp.where(row == 3, neg_e, 0.0))))


def pallas_elbo_stats(X, D, D_obs_counts, z, qz_mu, qz_logsig,
                      E, qE_mu, qE_logsig, W_dec, b_dec, x_logsig):
    f32 = jnp.float32
    n, x_dim = X.shape
    C = D.shape[1]

    # Packed input slabs (5 DMAs instead of 8; rw is derived in-kernel).
    xd = jnp.concatenate([X.astype(f32), D.astype(f32)], axis=-1)          # (n, x_dim + C)
    z_slab = jnp.concatenate(
        [z.astype(f32), qz_mu[None].astype(f32), qz_logsig[None].astype(f32)], axis=0)  # (P+2, n, L)
    e_slab = jnp.concatenate(
        [E.astype(f32), qE_mu[None].astype(f32), qE_logsig[None].astype(f32)], axis=0)  # (P+2, C, L)
    counts_row = jnp.zeros((x_dim,), f32).at[:C].set(D_obs_counts.astype(f32))
    const = jnp.stack(
        [b_dec.reshape(-1).astype(f32), x_logsig.reshape(-1).astype(f32), counts_row],
        axis=0)                                                            # (3, x_dim)

    vmem = pl.BlockSpec(memory_space=pltpu.MemorySpace.VMEM)
    stats = pl.pallas_call(
        elbo_loss_kernel,
        out_shape=jax.ShapeDtypeStruct((8, 128), f32),
        in_specs=[vmem] * 5,
        out_specs=vmem,
    )(xd, z_slab, e_slab, W_dec.astype(f32), const)
    # rows 0..3, lane 0: [loss, -mean_recon, -mean_z, -mean_E]
    return stats[:4, 0]


# ---------------------------------------------------------------------------
# Synthetic guide forward (plain-JAX glue: encoder + reparameterized sampling)
# ---------------------------------------------------------------------------
def perturbation_plated_elbo_loss(X, D, D_obs_counts, params, eps_z, eps_E):
    qz_mu = X @ params["W_mu"]                                   # (n, L)
    qz_logsig = 0.5 * jnp.tanh(X @ params["W_sig"])              # (n, L)
    z = qz_mu[None] + jnp.exp(qz_logsig)[None] * eps_z           # (P, n, L)

    qE_mu, qE_logsig = params["E_mu"], params["E_logsig"]        # (C, L)
    E = qE_mu[None] + jnp.exp(qE_logsig)[None] * eps_E           # (P, C, L)

    stats = pallas_elbo_stats(
        X, D, D_obs_counts, z, qz_mu, qz_logsig, E, qE_mu, qE_logsig,
        params["W_dec"], params["b_dec"], params["x_logsig"],
    )
    loss = stats[0]
    metrics = {
        "loss_term_reconstruction": stats[1],
        "loss_term_z": stats[2],
        "loss_term_E": stats[3],
    }
    samples = dict(z=z, E=E, qz_mu=qz_mu, qz_logsig=qz_logsig,
                   qE_mu=qE_mu, qE_logsig=qE_logsig)
    return loss, metrics, samples


# ---------------------------------------------------------------------------
# Pure-JAX reference (mirrors the torch code path: matmul then .sum(-1), then mean)
# ---------------------------------------------------------------------------
def reference_loss(X, D, D_obs_counts, params, samples):
    hi = jax.lax.Precision.HIGHEST
    z, E = samples["z"], samples["E"]
    qz_mu, qz_logsig = samples["qz_mu"], samples["qz_logsig"]
    qE_mu, qE_logsig = samples["qE_mu"], samples["qE_logsig"]

    latent = z + jnp.einsum("nc,pcl->pnl", D, E, precision=hi)
    x_mu = jnp.einsum("pnl,ld->pnd", latent, params["W_dec"], precision=hi) + params["b_dec"]
    x_logsig = params["x_logsig"]                                 # (1, x_dim)

    def nlp(x, mu, logsig):
        return -0.5 * ((x - mu) / jnp.exp(logsig)) ** 2 - logsig - 0.5 * LOG_2PI

    recon = nlp(X[None], x_mu, x_logsig[None]).sum(-1)                     # (P, n)
    z_term = (nlp(z, 0.0, 0.0) - nlp(z, qz_mu[None], qz_logsig[None])).sum(-1)
    lt = nlp(E, 0.0, 0.0) - nlp(E, qE_mu[None], qE_logsig[None])           # (P, C, L)
    counts = D_obs_counts.astype(jnp.float32)
    scaling = jnp.where(counts > 0, 1.0 / jnp.where(counts > 0, counts, 1.0), 0.0)
    rw = (D != 0).astype(jnp.float32) * scaling[None]                       # (n, C)
    e_term = jnp.einsum("nc,pcl->pnl", rw, lt, precision=hi).sum(-1)        # (P, n)

    elbo = recon + z_term + e_term
    return -jnp.mean(elbo), -recon.mean(), -z_term.mean(), -e_term.mean()


if __name__ == "__main__":
    key = jax.random.PRNGKey(0)
    keys = jax.random.split(key, 8)

    X = jax.random.normal(keys[0], (N_ROWS, X_DIM), jnp.float32)
    # binary perturbation indicators; condition index 3 gets zero observations
    # to exercise the 1/0 -> inf -> 0 path of the reweighting.
    D = jnp.zeros((N_ROWS, N_COND), jnp.float32).at[
        jnp.arange(N_ROWS), jnp.arange(N_ROWS) % 3
    ].set(1.0)
    D_obs_counts = D.sum(axis=0)                                  # (C,) with one zero

    params = {
        "W_mu": 0.1 * jax.random.normal(keys[1], (X_DIM, LATENT), jnp.float32),
        "W_sig": 0.1 * jax.random.normal(keys[2], (X_DIM, LATENT), jnp.float32),
        "E_mu": 0.1 * jax.random.normal(keys[3], (N_COND, LATENT), jnp.float32),
        "E_logsig": -0.5 * jnp.ones((N_COND, LATENT), jnp.float32),
        "W_dec": 0.1 * jax.random.normal(keys[4], (LATENT, X_DIM), jnp.float32),
        "b_dec": jnp.zeros((X_DIM,), jnp.float32),
        "x_logsig": jnp.zeros((1, X_DIM), jnp.float32),
    }
    eps_z = jax.random.normal(keys[5], (N_PART, N_ROWS, LATENT), jnp.float32)
    eps_E = jax.random.normal(keys[6], (N_PART, N_COND, LATENT), jnp.float32)

    loss, metrics, samples = perturbation_plated_elbo_loss(
        X, D, D_obs_counts, params, eps_z, eps_E
    )
    loss = jax.block_until_ready(loss)

    ref_loss, ref_recon, ref_z, ref_e = reference_loss(X, D, D_obs_counts, params, samples)
    np.testing.assert_allclose(np.asarray(loss), np.asarray(ref_loss),
                               rtol=1e-5, atol=1e-5)
    np.testing.assert_allclose(np.asarray(metrics["loss_term_reconstruction"]),
                               np.asarray(ref_recon), rtol=1e-5, atol=1e-5)
    np.testing.assert_allclose(np.asarray(metrics["loss_term_z"]),
                               np.asarray(ref_z), rtol=1e-5, atol=1e-5)
    np.testing.assert_allclose(np.asarray(metrics["loss_term_E"]),
                               np.asarray(ref_e), rtol=1e-5, atol=1e-5)
    for v in metrics.values():
        assert np.isfinite(np.asarray(v))

    print("KERNEL_OK")
</pallas_src>

<mosaic_0001>
module attributes {stable_mosaic.version = 11 : i64} {
  func.func @elbo_loss_kernel(%arg0: memref<8x36xf32, #tpu.memory_space<vmem>>, %arg1: memref<4x8x16xf32, #tpu.memory_space<vmem>>, %arg2: memref<4x4x16xf32, #tpu.memory_space<vmem>>, %arg3: memref<16x32xf32, #tpu.memory_space<vmem>>, %arg4: memref<3x32xf32, #tpu.memory_space<vmem>>, %arg5: memref<8x128xf32, #tpu.memory_space<vmem>>) attributes {dimension_semantics = [], scalar_prefetch = 0 : i64, scratch_operands = 0 : i64, tpu.core_type = #tpu.core_type<tc>} {
    %c0 = arith.constant 0 : index
    %c0_0 = arith.constant 0 : index
    %0 = vector.load %arg0[%c0, %c0_0] : memref<8x36xf32, #tpu.memory_space<vmem>>, vector<8x32xf32>
    %c0_1 = arith.constant 0 : index
    %c32 = arith.constant 32 : index
    %1 = vector.load %arg0[%c0_1, %c32] : memref<8x36xf32, #tpu.memory_space<vmem>>, vector<8x4xf32>
    %c0_2 = arith.constant 0 : index
    %c0_3 = arith.constant 0 : index
    %2 = vector.load %arg3[%c0_2, %c0_3] : memref<16x32xf32, #tpu.memory_space<vmem>>, vector<16x32xf32>
    %c0_4 = arith.constant 0 : index
    %c0_5 = arith.constant 0 : index
    %3 = vector.load %arg4[%c0_4, %c0_5] : memref<3x32xf32, #tpu.memory_space<vmem>>, vector<1x32xf32>
    %c1 = arith.constant 1 : index
    %c0_6 = arith.constant 0 : index
    %4 = vector.load %arg4[%c1, %c0_6] : memref<3x32xf32, #tpu.memory_space<vmem>>, vector<1x32xf32>
    %c2 = arith.constant 2 : index
    %c0_7 = arith.constant 0 : index
    %5 = vector.load %arg4[%c2, %c0_7] : memref<3x32xf32, #tpu.memory_space<vmem>>, vector<1x4xf32>
    %c2_8 = arith.constant 2 : index
    %c0_9 = arith.constant 0 : index
    %c0_10 = arith.constant 0 : index
    %6 = vector.load %arg1[%c2_8, %c0_9, %c0_10] : memref<4x8x16xf32, #tpu.memory_space<vmem>>, vector<1x8x16xf32>
    %7 = vector.shape_cast %6 : vector<1x8x16xf32> to vector<8x16xf32>
    %c3 = arith.constant 3 : index
    %c0_11 = arith.constant 0 : index
    %c0_12 = arith.constant 0 : index
    %8 = vector.load %arg1[%c3, %c0_11, %c0_12] : memref<4x8x16xf32, #tpu.memory_space<vmem>>, vector<1x8x16xf32>
    %9 = vector.shape_cast %8 : vector<1x8x16xf32> to vector<8x16xf32>
    %c2_13 = arith.constant 2 : index
    %c0_14 = arith.constant 0 : index
    %c0_15 = arith.constant 0 : index
    %10 = vector.load %arg2[%c2_13, %c0_14, %c0_15] : memref<4x4x16xf32, #tpu.memory_space<vmem>>, vector<1x4x16xf32>
    %11 = vector.shape_cast %10 : vector<1x4x16xf32> to vector<4x16xf32>
    %c3_16 = arith.constant 3 : index
    %c0_17 = arith.constant 0 : index
    %c0_18 = arith.constant 0 : index
    %12 = vector.load %arg2[%c3_16, %c0_17, %c0_18] : memref<4x4x16xf32, #tpu.memory_space<vmem>>, vector<1x4x16xf32>
    %13 = vector.shape_cast %12 : vector<1x4x16xf32> to vector<4x16xf32>
    %cst = arith.constant 0.000000e+00 : f32
    %14 = vector.broadcast %cst : f32 to vector<8x16xf32>
    %15 = arith.subf %14, %9 : vector<8x16xf32>
    %16 = math.exp %15 : vector<8x16xf32>
    %cst_19 = arith.constant 0.000000e+00 : f32
    %17 = vector.broadcast %cst_19 : f32 to vector<4x16xf32>
    %18 = arith.subf %17, %13 : vector<4x16xf32>
    %19 = math.exp %18 : vector<4x16xf32>
    %cst_20 = arith.constant 0.000000e+00 : f32
    %20 = vector.broadcast %cst_20 : f32 to vector<1x32xf32>
    %21 = arith.subf %20, %4 : vector<1x32xf32>
    %22 = math.exp %21 : vector<1x32xf32>
    %cst_21 = arith.constant 0.000000e+00 : f32
    %23 = vector.broadcast %cst_21 : f32 to vector<1x32xf32>
    %24 = arith.subf %23, %4 : vector<1x32xf32>
    %cst_22 = arith.constant 0.918938517 : f32
    %25 = vector.broadcast %cst_22 : f32 to vector<1x32xf32>
    %26 = arith.subf %24, %25 : vector<1x32xf32>
    %c0_23 = arith.constant 0 : index
    %c0_24 = arith.constant 0 : index
    %c0_25 = arith.constant 0 : index
    %27 = vector.load %arg1[%c0_23, %c0_24, %c0_25] : memref<4x8x16xf32, #tpu.memory_space<vmem>>, vector<1x8x16xf32>
    %28 = vector.shape_cast %27 : vector<1x8x16xf32> to vector<8x16xf32>
    %c0_26 = arith.constant 0 : index
    %c0_27 = arith.constant 0 : index
    %c0_28 = arith.constant 0 : index
    %29 = vector.load %arg2[%c0_26, %c0_27, %c0_28] : memref<4x4x16xf32, #tpu.memory_space<vmem>>, vector<1x4x16xf32>
    %30 = vector.shape_cast %29 : vector<1x4x16xf32> to vector<4x16xf32>
    %cst_29 = arith.constant dense<0.000000e+00> : vector<8x16xf32>
    %31 = tpu.matmul %1, %30, %cst_29 {dimension_numbers = #tpu.dot_dimension_numbers<[1], [0], [0], [1], [0, 0, 1, 1], [], []>} : vector<8x4xf32>, vector<4x16xf32>, vector<8x16xf32> -> vector<8x16xf32>
    %32 = arith.addf %28, %31 : vector<8x16xf32>
    %33 = arith.subf %28, %7 : vector<8x16xf32>
    %34 = arith.mulf %33, %16 : vector<8x16xf32>
    %cst_30 = arith.constant -5.000000e-01 : f32
    %35 = vector.broadcast %cst_30 : f32 to vector<8x16xf32>
    %36 = arith.mulf %35, %28 : vector<8x16xf32>
    %37 = arith.mulf %36, %28 : vector<8x16xf32>
    %cst_31 = arith.constant 5.000000e-01 : f32
    %38 = vector.broadcast %cst_31 : f32 to vector<8x16xf32>
    %39 = arith.mulf %38, %34 : vector<8x16xf32>
    %40 = arith.mulf %39, %34 : vector<8x16xf32>
    %41 = arith.addf %37, %40 : vector<8x16xf32>
    %42 = arith.addf %41, %9 : vector<8x16xf32>
    %43 = arith.subf %30, %11 : vector<4x16xf32>
    %44 = arith.mulf %43, %19 : vector<4x16xf32>
    %cst_32 = arith.constant -5.000000e-01 : f32
    %45 = vector.broadcast %cst_32 : f32 to vector<4x16xf32>
    %46 = arith.mulf %45, %30 : vector<4x16xf32>
    %47 = arith.mulf %46, %30 : vector<4x16xf32>
    %cst_33 = arith.constant 5.000000e-01 : f32
    %48 = vector.broadcast %cst_33 : f32 to vector<4x16xf32>
    %49 = arith.mulf %48, %44 : vector<4x16xf32>
    %50 = arith.mulf %49, %44 : vector<4x16xf32>
    %51 = arith.addf %47, %50 : vector<4x16xf32>
    %52 = arith.addf %51, %13 : vector<4x16xf32>
    %c1_34 = arith.constant 1 : index
    %c0_35 = arith.constant 0 : index
    %c0_36 = arith.constant 0 : index
    %53 = vector.load %arg1[%c1_34, %c0_35, %c0_36] : memref<4x8x16xf32, #tpu.memory_space<vmem>>, vector<1x8x16xf32>
    %54 = vector.shape_cast %53 : vector<1x8x16xf32> to vector<8x16xf32>
    %c1_37 = arith.constant 1 : index
    %c0_38 = arith.constant 0 : index
    %c0_39 = arith.constant 0 : index
    %55 = vector.load %arg2[%c1_37, %c0_38, %c0_39] : memref<4x4x16xf32, #tpu.memory_space<vmem>>, vector<1x4x16xf32>
    %56 = vector.shape_cast %55 : vector<1x4x16xf32> to vector<4x16xf32>
    %cst_40 = arith.constant dense<0.000000e+00> : vector<8x16xf32>
    %57 = tpu.matmul %1, %56, %cst_40 {dimension_numbers = #tpu.dot_dimension_numbers<[1], [0], [0], [1], [0, 0, 1, 1], [], []>} : vector<8x4xf32>, vector<4x16xf32>, vector<8x16xf32> -> vector<8x16xf32>
    %58 = arith.addf %54, %57 : vector<8x16xf32>
    %59 = arith.subf %54, %7 : vector<8x16xf32>
    %60 = arith.mulf %59, %16 : vector<8x16xf32>
    %cst_41 = arith.constant -5.000000e-01 : f32
    %61 = vector.broadcast %cst_41 : f32 to vector<8x16xf32>
    %62 = arith.mulf %61, %54 : vector<8x16xf32>
    %63 = arith.mulf %62, %54 : vector<8x16xf32>
    %cst_42 = arith.constant 5.000000e-01 : f32
    %64 = vector.broadcast %cst_42 : f32 to vector<8x16xf32>
    %65 = arith.mulf %64, %60 : vector<8x16xf32>
    %66 = arith.mulf %65, %60 : vector<8x16xf32>
    %67 = arith.addf %63, %66 : vector<8x16xf32>
    %68 = arith.addf %67, %9 : vector<8x16xf32>
    %69 = arith.addf %42, %68 : vector<8x16xf32>
    %70 = arith.subf %56, %11 : vector<4x16xf32>
    %71 = arith.mulf %70, %19 : vector<4x16xf32>
    %cst_43 = arith.constant -5.000000e-01 : f32
    %72 = vector.broadcast %cst_43 : f32 to vector<4x16xf32>
    %73 = arith.mulf %72, %56 : vector<4x16xf32>
    %74 = arith.mulf %73, %56 : vector<4x16xf32>
    %cst_44 = arith.constant 5.000000e-01 : f32
    %75 = vector.broadcast %cst_44 : f32 to vector<4x16xf32>
    %76 = arith.mulf %75, %71 : vector<4x16xf32>
    %77 = arith.mulf %76, %71 : vector<4x16xf32>
    %78 = arith.addf %74, %77 : vector<4x16xf32>
    %79 = arith.addf %78, %13 : vector<4x16xf32>
    %80 = arith.addf %52, %79 : vector<4x16xf32>
    %81 = tpu.concatenate %32, %58 in 0 : vector<8x16xf32>, vector<8x16xf32> -> vector<16x16xf32>
    %cst_45 = arith.constant dense<0.000000e+00> : vector<16x32xf32>
    %82 = tpu.matmul %81, %2, %cst_45 {dimension_numbers = #tpu.dot_dimension_numbers<[1], [0], [0], [1], [0, 0, 1, 1], [], []>} : vector<16x16xf32>, vector<16x32xf32>, vector<16x32xf32> -> vector<16x32xf32>
    %83 = vector.broadcast %3 : vector<1x32xf32> to vector<16x32xf32>
    %84 = arith.addf %82, %83 : vector<16x32xf32>
    %85 = vector.extract_strided_slice %84 {offsets = [0, 0], sizes = [8, 32], strides = [1, 1]} : vector<16x32xf32> to vector<8x32xf32>
    %86 = arith.subf %0, %85 : vector<8x32xf32>
    %87 = vector.broadcast %22 : vector<1x32xf32> to vector<8x32xf32>
    %88 = arith.mulf %86, %87 : vector<8x32xf32>
    %cst_46 = arith.constant 5.000000e-01 : f32
    %89 = vector.broadcast %cst_46 : f32 to vector<8x32xf32>
    %90 = arith.mulf %89, %88 : vector<8x32xf32>
    %91 = arith.mulf %90, %88 : vector<8x32xf32>
    %92 = vector.broadcast %26 : vector<1x32xf32> to vector<8x32xf32>
    %93 = arith.subf %92, %91 : vector<8x32xf32>
    %94 = vector.extract_strided_slice %84 {offsets = [8, 0], sizes = [8, 32], strides = [1, 1]} : vector<16x32xf32> to vector<8x32xf32>
    %95 = arith.subf %0, %94 : vector<8x32xf32>
    %96 = vector.broadcast %22 : vector<1x32xf32> to vector<8x32xf32>
    %97 = arith.mulf %95, %96 : vector<8x32xf32>
    %cst_47 = arith.constant 5.000000e-01 : f32
    %98 = vector.broadcast %cst_47 : f32 to vector<8x32xf32>
    %99 = arith.mulf %98, %97 : vector<8x32xf32>
    %100 = arith.mulf %99, %97 : vector<8x32xf32>
    %101 = vector.broadcast %26 : vector<1x32xf32> to vector<8x32xf32>
    %102 = arith.subf %101, %100 : vector<8x32xf32>
    %103 = arith.addf %93, %102 : vector<8x32xf32>
    %104 = vector.shape_cast %103 : vector<8x32xf32> to vector<1x8x32xf32>
    %cst_48 = arith.constant dense<0.000000e+00> : vector<1xf32>
    %105 = vector.multi_reduction <add>, %104, %cst_48 [1, 2] : vector<1x8x32xf32> to vector<1xf32>
    %106 = vector.shape_cast %105 : vector<1xf32> to vector<1x1x1xf32>
    %107 = vector.extract %106[0, 0, 0] : f32 from vector<1x1x1xf32>
    %108 = vector.shape_cast %69 : vector<8x16xf32> to vector<1x8x16xf32>
    %cst_49 = arith.constant dense<0.000000e+00> : vector<1xf32>
    %109 = vector.multi_reduction <add>, %108, %cst_49 [1, 2] : vector<1x8x16xf32> to vector<1xf32>
    %110 = vector.shape_cast %109 : vector<1xf32> to vector<1x1x1xf32>
    %111 = vector.extract %110[0, 0, 0] : f32 from vector<1x1x1xf32>
    %cst_50 = arith.constant 0.000000e+00 : f32
    %112 = vector.broadcast %cst_50 : f32 to vector<1x4xf32>
    %113 = arith.cmpf ogt, %5, %112 : vector<1x4xf32>
    %cst_51 = arith.constant 0.000000e+00 : f32
    %114 = vector.broadcast %cst_51 : f32 to vector<1x4xf32>
    %115 = arith.cmpf ogt, %5, %114 : vector<1x4xf32>
    %cst_52 = arith.constant 1.000000e+00 : f32
    %116 = vector.broadcast %cst_52 : f32 to vector<1x4xf32>
    %117 = arith.select %115, %5, %116 : vector<1x4xi1>, vector<1x4xf32>
    %cst_53 = arith.constant 1.000000e+00 : f32
    %118 = vector.broadcast %cst_53 : f32 to vector<1x4xf32>
    %119 = arith.divf %118, %117 : vector<1x4xf32>
    %cst_54 = arith.constant 0.000000e+00 : f32
    %120 = vector.broadcast %cst_54 : f32 to vector<1x4xf32>
    %121 = arith.select %113, %119, %120 : vector<1x4xi1>, vector<1x4xf32>
    %cst_55 = arith.constant 0.000000e+00 : f32
    %122 = vector.broadcast %cst_55 : f32 to vector<8x4xf32>
    %123 = arith.cmpf one, %1, %122 : vector<8x4xf32>
    %124 = arith.extui %123 : vector<8x4xi1> to vector<8x4xi32>
    %125 = arith.sitofp %124 : vector<8x4xi32> to vector<8x4xf32>
    %126 = vector.broadcast %121 : vector<1x4xf32> to vector<8x4xf32>
    %127 = arith.mulf %125, %126 : vector<8x4xf32>
    %cst_56 = arith.constant dense<0.000000e+00> : vector<8x16xf32>
    %128 = tpu.matmul %127, %80, %cst_56 {dimension_numbers = #tpu.dot_dimension_numbers<[1], [0], [0], [1], [0, 0, 1, 1], [], []>} : vector<8x4xf32>, vector<4x16xf32>, vector<8x16xf32> -> vector<8x16xf32>
    %129 = vector.shape_cast %128 : vector<8x16xf32> to vector<1x8x16xf32>
    %cst_57 = arith.constant dense<0.000000e+00> : vector<1xf32>
    %130 = vector.multi_reduction <add>, %129, %cst_57 [1, 2] : vector<1x8x16xf32> to vector<1xf32>
    %131 = vector.shape_cast %130 : vector<1xf32> to vector<1x1x1xf32>
    %132 = vector.extract %131[0, 0, 0] : f32 from vector<1x1x1xf32>
    %cst_58 = arith.constant 0.000000e+00 : f32
    %133 = arith.subf %cst_58, %107 : f32
    %cst_59 = arith.constant 6.250000e-02 : f32
    %134 = arith.mulf %133, %cst_59 : f32
    %cst_60 = arith.constant 0.000000e+00 : f32
    %135 = arith.subf %cst_60, %111 : f32
    %cst_61 = arith.constant 6.250000e-02 : f32
    %136 = arith.mulf %135, %cst_61 : f32
    %cst_62 = arith.constant 0.000000e+00 : f32
    %137 = arith.subf %cst_62, %132 : f32
    %cst_63 = arith.constant 6.250000e-02 : f32
    %138 = arith.mulf %137, %cst_63 : f32
    %139 = arith.addf %134, %136 : f32
    %140 = arith.addf %139, %138 : f32
    %141 = tpu.iota {dimensions = array<i32: 0>} : vector<8x128xi32>
    %c0_i32 = arith.constant 0 : i32
    %142 = vector.broadcast %c0_i32 : i32 to vector<8x128xi32>
    %143 = arith.cmpi eq, %141, %142 : vector<8x128xi32>
    %c1_i32 = arith.constant 1 : i32
    %144 = vector.broadcast %c1_i32 : i32 to vector<8x128xi32>
    %145 = arith.cmpi eq, %141, %144 : vector<8x128xi32>
    %c2_i32 = arith.constant 2 : i32
    %146 = vector.broadcast %c2_i32 : i32 to vector<8x128xi32>
    %147 = arith.cmpi eq, %141, %146 : vector<8x128xi32>
    %c3_i32 = arith.constant 3 : i32
    %148 = vector.broadcast %c3_i32 : i32 to vector<8x128xi32>
    %149 = arith.cmpi eq, %141, %148 : vector<8x128xi32>
    %cst_64 = arith.constant 0.000000e+00 : f32
    %150 = vector.broadcast %138 : f32 to vector<8x128xf32>
    %151 = vector.broadcast %cst_64 : f32 to vector<8x128xf32>
    %152 = arith.select %149, %150, %151 : vector<8x128xi1>, vector<8x128xf32>
    %153 = vector.broadcast %136 : f32 to vector<8x128xf32>
    %154 = arith.select %147, %153, %152 : vector<8x128xi1>, vector<8x128xf32>
    %155 = vector.broadcast %134 : f32 to vector<8x128xf32>
    %156 = arith.select %145, %155, %154 : vector<8x128xi1>, vector<8x128xf32>
    %157 = vector.broadcast %140 : f32 to vector<8x128xf32>
    %158 = arith.select %143, %157, %156 : vector<8x128xi1>, vector<8x128xf32>
    %c0_65 = arith.constant 0 : index
    %c0_66 = arith.constant 0 : index
    %159 = vector.load %arg5[%c0_65, %c0_66] : memref<8x128xf32, #tpu.memory_space<vmem>>, vector<8x128xf32>
    tpu.vector_store %arg5[%c0_65, %c0_66], %158 {strides = array<i32>} : memref<8x128xf32, #tpu.memory_space<vmem>>, vector<8x128xf32>,
    return
  }
}

</mosaic_0001>

<bundles_post_ra>
// kernel: tpu_custom_call.1
= control target key start
LH: loop header
LB: loop body
LE: loop exit
PB: predicated region body
PF: predicated region fallthrough
CT: control target
= control target key end

     0   :  { %10 = vsyncpa [#allocation3], 0  ;;  %s909_s0 = inlined_call_operand.hbm [shape: f32[8,36], index: 0, kind: input, shape index: {}]   ;;  %s910_s1 = inlined_call_operand.hbm [shape: f32[4,8,16], index: 1, kind: input, shape index: {}]   ;;  %s911_s2 = inlined_call_operand.hbm [shape: f32[4,4,16], index: 2, kind: input, shape index: {}]   ;;  %s912_s3 = inlined_call_operand.hbm [shape: f32[16,32], index: 3, kind: input, shape index: {}]   ;;  %s913_s4 = inlined_call_operand.vmem [shape: f32[3,32], index: 4, kind: input, shape index: {}]   ;;  %s914_s5 = inlined_call_operand.hbm [shape: f32[8,128], index: 5, kind: output, shape index: {}]  }
   0x1   :  { %11 = vsyncpa [#allocation6], 0 }
   0x2   :  { %12 = vsyncpa [#allocation9], 0 }
   0x3   :  { %13 = vsyncpa [#allocation4], 0  ;;  %s756_s18 = smov [#allocation5]   ;;  %s638_s22 = scalar_lea.hbm %s910_s1, 512 }
   0x4   :  { %s29_s19 = sshll.u32 %s756_s18, 4  ;;  %p639_p0 = scmp.ne.s32.totalorder %s910_s1, %s638_s22  ;;  %s30_s19 = int_to_ptr.vmem [resolvable:$true] %s29_s19 }
   0x5   :  { %p642_p1 = scmp.lt.u32.totalorder %s638_s22, %s910_s1 }
   0x7   :  { %p644_p2 = pnand %p642_p1, %p639_p0 }
   0x9   :  { %647 = shalt.err (!%p644_p2)
}
   0xa   :  { %s648_s27 = scalar_lea.vmem %s30_s19, 512  ;;  %p653_p4 = scmp.lt.s32.totalorder %s30_s19, %s30_s19 }
   0xb   :  { %p649_p3 = scmp.ne.s32.totalorder %s30_s19, %s648_s27  ;;  %p654_p5 = scmp.lt.s32.totalorder %s648_s27, %s648_s27 }
   0xd   :  { %p655_p6 = por %p654_p5, %p653_p4 }
   0xf   :  { %p656_p7 = pnand %p655_p6, %p649_p3 }
  0x11   :  { %659 = shalt.err (!%p656_p7)
}
  0x12   :  { %s757_s28 = smov 128   ;;  %s758_s29 = smov 8  }
  0x13   :  { %35 = dma.hbm_to_vmem [thread:$0]  %s910_s1, 512, %s30_s19, [#allocation6], %s757_s28, %s757_s28, %s758_s29  }
  0x14   :  { %s759_s7 = smov [#allocation2]   ;;  %s760_s9 = smov [#allocation7]  }
  0x15   :  { %s20_s8 = sshll.u32 %s759_s7, 4  ;;  %s41_s10 = sshll.u32 %s760_s9, 4  ;;  %s21_s8 = int_to_ptr.vmem [resolvable:$true] %s20_s8  ;;  %s42_s10 = int_to_ptr.vmem [resolvable:$true] %s41_s10 }
  0x16   :  { %s660_s13 = scalar_lea.hbm %s909_s0, 128 }
  0x17   :  { %p661_p8 = scmp.ne.s32.totalorder %s909_s0, %s660_s13  ;;  %p664_p9 = scmp.lt.u32.totalorder %s660_s13, %s909_s0 }
  0x19   :  { %p666_p10 = pnand %p664_p9, %p661_p8 }
  0x1b   :  { %669 = shalt.err (!%p666_p10)
}
  0x1c   :  { %s670_s1 = scalar_lea.vmem %s21_s8, 128  ;;  %p675_p12 = scmp.lt.s32.totalorder %s21_s8, %s21_s8 }
  0x1d   :  { %p671_p11 = scmp.ne.s32.totalorder %s21_s8, %s670_s1  ;;  %p676_p13 = scmp.lt.s32.totalorder %s670_s1, %s670_s1 }
  0x1f   :  { %p677_p0 = por %p676_p13, %p675_p12 }
  0x21   :  { %p678_p1 = pnand %p677_p0, %p671_p11 }
  0x23   :  { %681 = shalt.err (!%p678_p1)
}
  0x24   :  { %23 = dma.hbm_to_vmem [thread:$0]  %s909_s0, 128, %s21_s8, [#allocation3]  }
  0x25   :  { %s682_s22 = scalar_lea.hbm %s911_s2, 256 }
  0x26   :  { %p683_p2 = scmp.ne.s32.totalorder %s911_s2, %s682_s22  ;;  %p686_p3 = scmp.lt.u32.totalorder %s682_s22, %s911_s2 }
  0x28   :  { %p688_p4 = pnand %p686_p3, %p683_p2 }
  0x2a   :  { %691 = shalt.err (!%p688_p4)
}
  0x2b   :  { %s692_s27 = scalar_lea.vmem %s42_s10, 256  ;;  %p697_p6 = scmp.lt.s32.totalorder %s42_s10, %s42_s10 }
  0x2c   :  { %p693_p5 = scmp.ne.s32.totalorder %s42_s10, %s692_s27  ;;  %p698_p7 = scmp.lt.s32.totalorder %s692_s27, %s692_s27 }
  0x2e   :  { %p699_p8 = por %p698_p7, %p697_p6 }
  0x30   :  { %p700_p9 = pnand %p699_p8, %p693_p5 }
  0x32   :  { %703 = shalt.err (!%p700_p9)
}
  0x33   :  { %s761_s0 = smov 64   ;;  %s762_s30 = smov 4  }
  0x34   :  { %47 = dma.hbm_to_vmem [thread:$0]  %s911_s2, 256, %s42_s10, [#allocation6], %s761_s0, %s761_s0, %s762_s30  }
  0x35   :  { %s763_s8 = smov [#allocation8]   ;;  %s704_s13 = scalar_lea.hbm %s912_s3, 256 }
  0x36   :  { %s53_s9 = sshll.u32 %s763_s8, 4  ;;  %p705_p10 = scmp.ne.s32.totalorder %s912_s3, %s704_s13  ;;  %s54_s9 = int_to_ptr.vmem [resolvable:$true] %s53_s9 }
  0x37   :  { %p708_p11 = scmp.lt.u32.totalorder %s704_s13, %s912_s3 }
  0x39   :  { %p710_p12 = pnand %p708_p11, %p705_p10 }
  0x3b   :  { %713 = shalt.err (!%p710_p12)
}
  0x3c   :  { %s714_s1 = scalar_lea.vmem %s54_s9, 256  ;;  %p719_p0 = scmp.lt.s32.totalorder %s54_s9, %s54_s9 }
  0x3d   :  { %p715_p13 = scmp.ne.s32.totalorder %s54_s9, %s714_s1  ;;  %p720_p1 = scmp.lt.s32.totalorder %s714_s1, %s714_s1 }
  0x3f   :  { %p721_p2 = por %p720_p1, %p719_p0 }
  0x41   :  { %p722_p3 = pnand %p721_p2, %p715_p13 }
  0x43   :  { %725 = shalt.err (!%p722_p3)
}
  0x44   :  { %59 = dma.hbm_to_vmem [thread:$0]  %s912_s3, 256, %s54_s9, [#allocation9], %s757_s28, %s757_s28, %s758_s29  }
  0x45   :  { %748 = dma.done.wait [#allocation3], 128  }
  0x46   :  { %749 = vsyncadd [#allocation3], 4294967168 }
  0x47   :  { %750 = dma.done.wait [#allocation6], 768  }
  0x48   :  { %751 = vsyncadd [#allocation6], 4294966528 }
  0x49   :  { %752 = dma.done.wait [#allocation9], 256  }
  0x4a   :  { %753 = vsyncadd [#allocation9], 4294967040  ;;  %v764_v0 = vmov 0.0   ;;  %vm765_vm0 = vmmov 0   ;;  %vm106_vm1 = vcmask 1043456   ;;  %v855_v1 = vld [vmem:[#allocation2] sm:$0xff]  ;;  %v380_v6 = vlaneseq }
  0x4b   :  { %585 = vmatprep.subr.mxu0 %v764_v0  ;;  %590 = vmatprep.subr.mxu1 %v764_v0  ;;  %v79_v2 = vld [vmem:[%s913_s4 + $0x2] sm:$0x1]  ;;  %s766_s3 = smov 96   ;;  %v99_v3 = vld [vmem:[#allocation7] sm:$0xf]  ;;  %v75_v7 = vld [vmem:[#allocation8] sm:$0xff] }
  0x4c   :  { %587 = vmatprep.mubr.msk.f32.mxu0 %vm765_vm0, %v764_v0  ;;  %592 = vmatprep.mubr.msk.f32.mxu1 %vm765_vm0, %v764_v0  ;;  %vm419_vm2 = vcmp.gt.f32.partialorder %v79_v2, 0.0  ;;  %v200_v5 = vld [vmem:[#allocation7 + $0x4] sm:$0xf]  ;;  %v76_v8 = vld [vmem:[#allocation8 + $0x8] sm:$0xff]  ;;  %v865_v9 = vshrl.u32 %v380_v6, 7  ;;  %s767_s28 = smov 32  }
  0x4d   :  { %101 = vrot.lane.b32.xlu0 %v855_v1, %s766_s3  ;;  %v420_v4 = vsel %vm419_vm2, %v79_v2, 1.0  ;;  %586 = vmatpush3.msk.msra.mxu0 %vm106_vm1, %v99_v3  ;;  %v607_v10 = vpack.c.bf16 %v76_v8, %v75_v7  ;;  %vm103_vm3 = vcmask 31744   ;;  %vm424_vm4 = vcmp.ne.f32.partialorder %v855_v1, 0.0  ;;  %v87_v19 = vld [vmem:[#allocation7 + $0xc] sm:$0xf]  ;;  %v98_v42 = vld [vmem:[#allocation5] sm:$0xff] }
  0x4e   :  { %630 = vrcp.f32 %v420_v4  ;;  %591 = vmatpush3.msk.msra.mxu1 %vm106_vm1, %v200_v5  ;;  %v868_v11 = vsub.s32 0, %v865_v9  ;;  %v572_v16 = vsel %vm424_vm4, 1.0, %v764_v0  ;;  %v91_v20 = vsub.f32 0.0, %v87_v19  ;;  %v85_v22 = vld [vmem:[#allocation7 + $0x8] sm:$0xf]  ;;  %v83_v50 = vld [vmem:[#allocation5 + $0x18] sm:$0xff] }
  0x4f   :  { %602 = vmatprep.subr.mxu1 %v764_v0  ;;  %608 = vmatprep.subr.bf16.mxu0 %v607_v10  ;;  %v189_v23 = vsub.f32 %v99_v3, %v85_v22  ;;  %v284_v24 = vsub.f32 %v200_v5, %v85_v22  ;;  %v191_v28 = vmul.f32 -0.5, %v99_v3  ;;  %v286_v30 = vmul.f32 -0.5, %v200_v5  ;;  %v198_v43 = vld [vmem:[#allocation5 + $0x8] sm:$0xff]  ;;  %v81_v53 = vld [vmem:[#allocation5 + $0x10] sm:$0xff]  ;;  %s768_s8 = smov [#allocation10]  }
  0x50   :  { %v92_v21 = vmul.f32 1.442695, %v91_v20  ;;  %vm297_vm5 = vcmask 130048   ;;  %v88_v51 = vsub.f32 0.0, %v83_v50  ;;  %v181_v54 = vsub.f32 %v98_v42, %v81_v53  ;;  %s553_s9 = sshll.u32 %s768_s8, 4  ;;  %s554_s9 = int_to_ptr.vmem [resolvable:$true] %s553_s9 }
  0x51   :  { %v192_v32 = vmul.f32 %v191_v28, %v99_v3  ;;  %v287_v34 = vmul.f32 %v286_v30, %v200_v5  ;;  %v275_v55 = vsub.f32 %v198_v43, %v81_v53  ;;  %v183_v57 = vmul.f32 -0.5, %v98_v42  ;;  %s726_s12 = scalar_lea.vmem %s554_s9, 128  ;;  %p731_p5 = scmp.lt.s32.totalorder %s554_s9, %s554_s9 }
  0x52   :  { %632 = vpow2.f32 %v92_v21  ;;  %v89_v52 = vmul.f32 1.442695, %v88_v51  ;;  %v277_v58 = vmul.f32 -0.5, %v198_v43  ;;  %vm398_vm6 = vcmask 261120   ;;  %p727_p4 = scmp.ne.s32.totalorder %s554_s9, %s726_s12  ;;  %p732_p6 = scmp.lt.s32.totalorder %s726_s12, %s726_s12 }
  0x53   :  { %v184_v63 = vmul.f32 %v183_v57, %v98_v42  ;;  %vm537_vm7 = vcmp.eq.s32.totalorder %v865_v9, 3  ;;  %vm536_vm8 = vcmp.eq.s32.totalorder %v865_v9, 2  ;;  %vm535_vm9 = vcmp.eq.s32.totalorder %v865_v9, 1 }
  0x54   :  { %634 = vpow2.f32 %v89_v52  ;;  %v278_v2 = vmul.f32 %v277_v58, %v198_v43  ;;  %vm534_vm10 = vcmp.eq.s32.totalorder %v865_v9, 0  ;;  %p733_p7 = por %p732_p6, %p731_p5 }
  0x56   :  { %p734_p8 = pnand %p733_p7, %p727_p4 }
  0x58   :  { %v631_v12 = vpop.eup %630 }
  0x59   :  { %v423_v13 = vsel %vm419_vm2, %v631_v12, 0.0 }
  0x5a   :  { %v430_v14 = vrot.slane %v423_v13, %v868_v11 }
  0x5c   :  { %432 = vrot.lane.b32.xlu0 %v430_v14, %s767_s28  ;;  %v633_v25 = vpop.eup %632 }
  0x5d   :  { %v190_v26 = vmul.f32 %v633_v25, %v189_v23  ;;  %v285_v27 = vmul.f32 %v633_v25, %v284_v24 }
  0x5e   :  { %v635_v56 = vpop.eup %634 }
  0x5f   :  { %v193_v29 = vmul.f32 0.5, %v190_v26  ;;  %v288_v31 = vmul.f32 0.5, %v285_v27  ;;  %v182_v59 = vmul.f32 %v635_v56, %v181_v54  ;;  %v276_v60 = vmul.f32 %v635_v56, %v275_v55 }
  0x61   :  { %v194_v33 = vmul.f32 %v193_v29, %v190_v26  ;;  %v289_v35 = vmul.f32 %v288_v31, %v285_v27  ;;  %v185_v61 = vmul.f32 0.5, %v182_v59  ;;  %v279_v62 = vmul.f32 0.5, %v276_v60 }
  0x63   :  { %v195_v36 = vadd.f32 %v194_v33, %v192_v32  ;;  %v290_v37 = vadd.f32 %v289_v35, %v287_v34  ;;  %v280_v3 = vmul.f32 %v279_v62, %v276_v60 }
  0x65   :  { %v196_v38 = vadd.f32 %v195_v36, %v87_v19  ;;  %v291_v39 = vadd.f32 %v290_v37, %v87_v19  ;;  %v281_v5 = vadd.f32 %v280_v3, %v278_v2  ;;  %v569_v19 = vld [vmem:[%s913_s4] ss:$0 sm:$0xff] }
  0x67   :  { %v292_v40 = vadd.f32 %v291_v39, %v196_v38  ;;  %v282_v7 = vadd.f32 %v281_v5, %v83_v50 }
  0xbf   :  { %v102_v15 = vpop.permute.xlu0 %101 }
  0xc0   :  { %588 = vmatmul.mubr.msk.f32.vlgmr.msra.gmra.mrb[0].mxu0 %vm103_vm3, %v102_v15  ;;  %593 = vmatmul.mubr.msk.f32.vlgmr.msra.gmra.mrb[0].mxu1 %vm103_vm3, %v102_v15  ;;  %v78_v15 = vld [vmem:[%s913_s4 + $0x1] sm:$0x1] }
  0xc1   :  { %610 = vmatpush3.bf16.msra.mxu0 %v607_v10  ;;  %604 = vmatprep.mubr.msk.f32.mxu1 %vm765_vm0, %v764_v0  ;;  %v186_v0 = vmul.f32 %v185_v61, %v182_v59 }
  0xc2   :  { %603 = vmatpush3.msk.msra.mxu1 %vm106_vm1, %v292_v40 }
  0xc3   :  { %v187_v4 = vadd.f32 %v186_v0, %v184_v63 }
  0xc5   :  { %v188_v6 = vadd.f32 %v187_v4, %v83_v50 }
  0xc7   :  { %v283_v8 = vadd.f32 %v282_v7, %v188_v6 }
  0xc9   :  { %v409_v10 = vsel %vm297_vm5, %v283_v8, 0.0 }
  0xca   :  { %410 = vadd.xlane.f32.xlu0 %v409_v10 }
  0xce   :  { %v433_v17 = vpop.permute.xlu0 %432 }
  0xcf   :  { %v435_v18 = vmul.f32 %v572_v16, %v433_v17  ;;  %v94_v16 = vsub.f32 0.0, %v78_v15 }
  0xd1   :  { %437 = vrot.lane.b32.xlu1 %v435_v18, %s766_s3  ;;  %v95_v17 = vmul.f32 1.442695, %v94_v16  ;;  %v564_v26 = vadd.f32 -0.9189385, %v94_v16 }
  0xd3   :  { %636 = vpow2.f32 %v95_v17  ;;  %v390_v31 = vrot.slane %v564_v26, %v868_v11 }
  0xdd   :  { %v637_v18 = vpop.eup %636 }
  0xde   :  { %v383_v22 = vrot.slane %v637_v18, %v868_v11 }
 0x143   :  { %v438_v41 = vpop.permute.xlu1 %437 }
 0x144   :  { %605 = vmatmul.mubr.msk.f32.vlgmr.msra.gmra.mrb[2].mxu1 %vm103_vm3, %v438_v41 }
 0x157   :  { %v411_v39 = vpop.xlane.xlu0 %410 }
 0x158   :  { %v412_v41 = vrot.slane %v411_v39, 4 }
 0x193   :  { %v176_v44 = vpop.f32.mrb[0].mxu0  ;;  %v270_v45 = vpop.f32.mrb[0].mxu1 }
 0x194   :  { %v180_v46 = vadd.f32 %v176_v44, %v98_v42  ;;  %v274_v47 = vadd.f32 %v270_v45, %v198_v43  ;;  %v589_v48 = vpop.f32.mrb[1].mxu0  ;;  %v594_v49 = vpop.f32.mrb[1].mxu1  ;;  %v413_v43 = vadd.f32 %v412_v41, %v411_v39 }
 0x196   :  { %599 = vmatprep.mubr.msk.f32.mxu0 %vm297_vm5, %v180_v46  ;;  %v414_v44 = vrot.slane %v413_v43, 2 }
 0x197   :  { %600 = vmatmul.mubr.msk.f32.vlgmr.msra.gmra.mrb[2].mxu0 %vm297_vm5, %v274_v47 }
 0x198   :  { %v415_v48 = vadd.f32 %v414_v44, %v413_v43 }
 0x19a   :  { %v416_v52 = vrot.slane %v415_v48, 1 }
 0x19c   :  { %v417_v56 = vadd.f32 %v416_v52, %v415_v48 }
 0x217   :  { %v510_v12 = vpop.f32.mrb[2].mxu1 }
 0x218   :  { %v514_v13 = vsel %vm297_vm5, %v510_v12, 0.0  ;;  %v606_v14 = vpop.f32.mrb[3].mxu1 }
 0x219   :  { %515 = vadd.xlane.f32.xlu0 %v514_v13 }
 0x26a   :  { %v601_v20 = vpop.f32.mrb[2].mxu0 }
 0x26b   :  { %v376_v21 = vadd.f32 %v601_v20, %v569_v19  ;;  %v370_v23 = vpop.f32.mrb[3].mxu0 }
 0x26c   :  { %v371_v24 = vadd.f32 %v569_v19, %v370_v23 }
 0x26d   :  { %v392_v25 = vsub.f32 %v855_v1, %v376_v21 }
 0x26e   :  { %v379_v27 = vsub.f32 %v855_v1, %v371_v24 }
 0x26f   :  { %v393_v28 = vmul.f32 %v392_v25, %v383_v22 }
 0x270   :  { %v384_v29 = vmul.f32 %v383_v22, %v379_v27 }
 0x271   :  { %v394_v30 = vmul.f32 0.5, %v393_v28 }
 0x272   :  { %v385_v32 = vmul.f32 0.5, %v384_v29 }
 0x273   :  { %v395_v33 = vmul.f32 %v394_v30, %v393_v28 }
 0x274   :  { %v386_v34 = vmul.f32 %v385_v32, %v384_v29 }
 0x275   :  { %v396_v35 = vsub.f32 %v390_v31, %v395_v33 }
 0x276   :  { %v391_v36 = vsub.f32 %v390_v31, %v386_v34 }
 0x278   :  { %v397_v37 = vadd.f32 %v396_v35, %v391_v36 }
 0x27a   :  { %v399_v38 = vsel %vm398_vm6, %v397_v37, 0.0 }
 0x27b   :  { %400 = vadd.xlane.f32.xlu1 %v399_v38 }
 0x2a6   :  { %v516_v40 = vpop.xlane.xlu0 %515 }
 0x2a7   :  { %v517_v42 = vrot.slane %v516_v40, 4 }
 0x2a9   :  { %v518_v1 = vadd.f32 %v517_v42, %v516_v40 }
 0x2ab   :  { %v519_v46 = vrot.slane %v518_v1, 2 }
 0x2ad   :  { %v520_v49 = vadd.f32 %v519_v46, %v518_v1 }
 0x2af   :  { %v521_v54 = vrot.slane %v520_v49, 1 }
 0x2b1   :  { %v522_v57 = vadd.f32 %v521_v54, %v520_v49 }
 0x308   :  { %v401_v45 = vpop.xlane.xlu1 %400 }
 0x309   :  { %v402_v47 = vrot.slane %v401_v45, 4 }
 0x30b   :  { %v403_v11 = vadd.f32 %v402_v47, %v401_v45 }
 0x30d   :  { %v404_v50 = vrot.slane %v403_v11, 2 }
 0x30f   :  { %v405_v51 = vadd.f32 %v404_v50, %v403_v11 }
 0x311   :  { %v406_v53 = vrot.slane %v405_v51, 1 }
 0x313   :  { %v407_v55 = vadd.f32 %v406_v53, %v405_v51 }
 0x315   :  { %611 = vpush %v407_v55 }
 0x316   :  { %613 = vpush %v417_v56 }
 0x317   :  { %615 = vpush %v522_v57 }
 0x346   :  { %s612_s4 = spop %611 }
 0x347   :  { %s524_s23 = ssub.f32 0.0, %s612_s4  ;;  %s614_s24 = spop %613 }
 0x348   :  { %s526_s25 = ssub.f32 0.0, %s614_s24  ;;  %s616_s26 = spop %615 }
 0x349   :  { %s525_s27 = smul.f32 0.0625, %s524_s23  ;;  %s528_s0 = ssub.f32 0.0, %s616_s26 }
 0x34a   :  { %s527_s30 = smul.f32 0.0625, %s526_s25 }
 0x34b   :  { %s529_s6 = smul.f32 0.0625, %s528_s0  ;;  %v542_v61 = vstv %s525_s27 }
 0x34c   :  { %s530_s7 = sadd.f32 %s527_s30, %s525_s27  ;;  %v540_v58 = vstv %s527_s30 }
 0x34d   :  { %v538_v59 = vstv %s529_s6 }
 0x34e   :  { %s531_s11 = sadd.f32 %s530_s7, %s529_s6  ;;  %v539_v60 = vsel %vm537_vm7, %v538_v59, 0.0 }
 0x34f   :  { %v541_v62 = vsel %vm536_vm8, %v540_v58, %v539_v60 }
 0x350   :  { %v544_v63 = vstv %s531_s11  ;;  %v543_v0 = vsel %vm535_vm9, %v542_v61, %v541_v62 }
 0x351   :  { %v545_v2 = vsel %vm534_vm10, %v544_v63, %v543_v0 }
 0x352   :  { %546 = vst [vmem:[#allocation10] sm:$0xff] %v545_v2 }
 0x353   :  { %737 = shalt.err (!%p734_p8)
}
 0x354   :  { %s738_s15 = scalar_lea.hbm %s914_s5, 128 }
 0x355   :  { %p739_p9 = scmp.ne.s32.totalorder %s914_s5, %s738_s15  ;;  %p742_p10 = scmp.lt.u32.totalorder %s738_s15, %s914_s5 }
 0x357   :  { %p744_p11 = pnand %p742_p10, %p739_p9 }
 0x359   :  { %747 = shalt.err (!%p744_p11)
}
 0x35a   :  { %556 = dma.vmem_to_hbm [thread:$0]  %s554_s9, 128, %s914_s5, [#allocation4]  }
 0x35b   :  { %754 = dma.done.wait [#allocation4], 128  }
 0x35c   :  { %755 = vsyncadd [#allocation4], 4294967168 }
 0x35d   :  { %560 = vsyncpa [#allocation3], 1 }
 0x35e   :  { %561 = vsyncpa [#allocation6], 1 }
 0x35f   :  { %562 = vsyncpa [#allocation9], 1 }
 0x360   :  { %563 = vsyncpa [#allocation4], 1 }

</bundles_post_ra>
